<compile_context>
chip_gen: v7x
topology: tpu7x:2x2x1
jax: 0.10.0
libtpu: 0.0.40
codegen_flags: <defaults>
</compile_context>

<pallas_src>
import jax
import jax.numpy as jnp
from jax.experimental import pallas as pl
from jax.experimental.pallas import tpu as pltpu


def attention_kernel(q_ref, ctx_ref, mask_ref,
                     wq_ref, bq_ref, wc_ref, bc_ref, we_ref,
                     woc_ref, woq_ref, bo_ref,
                     out_ref, attn_ref):
    # One batch element per grid step.
    q = q_ref[0]                       # (Q, Dq) f32
    c = ctx_ref[0]                     # (C, Dc) f32

    # mapped_query / mapped_context (MXU dots, f32 accumulation).
    mq = jnp.dot(q, wq_ref[...], preferred_element_type=jnp.float32) + bq_ref[...]   # (Q, H)
    mc = jnp.dot(c, wc_ref[...], preferred_element_type=jnp.float32) + bc_ref[...]   # (C, H)

    # emission[q, c] = w_emit . tanh(mq[q] + mc[c])
    # (w_emit bias omitted: it cancels under softmax.)
    e_in = jnp.tanh(mq[:, None, :] + mc[None, :, :])                  # (Q, C, H)
    emission = jnp.sum(e_in * we_ref[...][None, :, :], axis=-1)       # (Q, C)

    # Mask + numerically-safe softmax over the context axis.
    valid = mask_ref[0] != 0                                          # (1, C) bool
    neg_inf = jnp.float32(-jnp.inf)
    emission = jnp.where(valid, emission, neg_inf)                    # (Q, C)
    row_max = jnp.max(emission, axis=-1, keepdims=True)               # (Q, 1)
    safe_max = jnp.where(row_max == neg_inf, 0.0, row_max)
    p = jnp.exp(emission - safe_max)                                  # masked -> 0
    denom = jnp.sum(p, axis=-1, keepdims=True)                        # (Q, 1)
    denom_safe = jnp.where(denom > 0.0, denom, 1.0)
    attn = p / denom_safe                                             # all-masked row -> 0 (PyTorch NaN fill)

    # weighted_context = attn @ context ; fused concat + linear_out + tanh.
    weighted = jnp.dot(attn, c, preferred_element_type=jnp.float32)   # (Q, Dc)
    out = jnp.tanh(
        jnp.dot(weighted, woc_ref[...], preferred_element_type=jnp.float32)
        + jnp.dot(q, woq_ref[...], preferred_element_type=jnp.float32)
        + bo_ref[...]
    )                                                                 # (Q, Dq)

    out_ref[0] = out.astype(out_ref.dtype)
    attn_ref[0] = attn.astype(attn_ref.dtype)


def prepare_params(wq, bq, wc, bc, we, be, wo, bo, context_dim):
    """One-time parameter prep: PyTorch nn.Linear layout -> kernel layout.

    wq: (H, Dq), wc: (H, Dc), we: (1, H), wo: (Dq, Dc+Dq); biases 1-D.
    The w_emit bias `be` is dropped: softmax is invariant to it.
    """
    del be  # cancels under softmax
    f32 = jnp.float32
    return dict(
        wq_t=wq.T.astype(f32),                         # (Dq, H)
        bq=bq.reshape(1, -1).astype(f32),              # (1, H)
        wc_t=wc.T.astype(f32),                         # (Dc, H)
        bc=bc.reshape(1, -1).astype(f32),              # (1, H)
        we_row=we.reshape(1, -1).astype(f32),          # (1, H)
        wo_ctx_t=wo[:, :context_dim].T.astype(f32),    # (Dc, Dq) -- weighted-context rows
        wo_qry_t=wo[:, context_dim:].T.astype(f32),    # (Dq, Dq) -- query rows
        bo=bo.reshape(1, -1).astype(f32),              # (1, Dq)
    )


def attention_forward(query, context, mask, params):
    """query (B,Q,Dq) f32, context (B,C,Dc) f32, mask (B,C) bool (True = keep)."""
    B, Q, Dq = query.shape
    _, C, Dc = context.shape
    H = params["wq_t"].shape[1]

    mask_i32 = mask.astype(jnp.int32).reshape(B, 1, C)

    def batch_block(shape):
        return pl.BlockSpec(shape, lambda b: (b,) + (0,) * (len(shape) - 1))

    def resident(shape):
        return pl.BlockSpec(shape, lambda b: (0,) * len(shape))

    out, attn = pl.pallas_call(
        attention_kernel,
        out_shape=(jax.ShapeDtypeStruct((B, Q, Dq), jnp.float32),
                   jax.ShapeDtypeStruct((B, Q, C), jnp.float32)),
        grid=(B,),
        in_specs=[
            batch_block((1, Q, Dq)),                   # query
            batch_block((1, C, Dc)),                   # context
            batch_block((1, 1, C)),                    # mask
            resident((Dq, H)), resident((1, H)),       # w_query (pre-transposed), bias
            resident((Dc, H)), resident((1, H)),       # w_context (pre-transposed), bias
            resident((1, H)),                          # w_emit row
            resident((Dc, Dq)), resident((Dq, Dq)),    # linear_out, pre-split
            resident((1, Dq)),                         # linear_out bias
        ],
        out_specs=(batch_block((1, Q, Dq)), batch_block((1, Q, C))),
        compiler_params=pltpu.CompilerParams(dimension_semantics=("parallel",)),
    )(query.astype(jnp.float32), context.astype(jnp.float32), mask_i32,
      params["wq_t"], params["bq"], params["wc_t"], params["bc"],
      params["we_row"], params["wo_ctx_t"], params["wo_qry_t"], params["bo"])
    return out, attn


def reference(query, context, mask, wq, bq, wc, bc, we, be, wo, bo):
    """Pure-JAX mirror of the PyTorch Attention.forward."""
    mq = query @ wq.T + bq                                        # (B, Q, H)
    mc = context @ wc.T + bc                                      # (B, C, H)
    e = jnp.tanh(mq[:, :, None, :] + mc[:, None, :, :])           # (B, Q, C, H)
    emission = jnp.einsum("bqch,h->bqc", e, we[0]) + be[0]        # (B, Q, C)
    emission = jnp.where(mask[:, None, :], emission, -jnp.inf)
    attn = jax.nn.softmax(emission, axis=-1)
    attn = jnp.where(jnp.isnan(attn), 0.0, attn)                  # all-masked rows -> 0
    weighted = jnp.einsum("bqc,bcd->bqd", attn, context)          # (B, Q, Dc)
    combined = jnp.concatenate([weighted, query], axis=-1)        # (B, Q, Dc+Dq)
    output = jnp.tanh(combined @ wo.T + bo)                       # (B, Q, Dq)
    return output, attn


if __name__ == "__main__":
    key = jax.random.PRNGKey(0)
    B, Q, C = 2, 8, 16            # batch, query_len, context_len
    Dq, Dc, H = 32, 48, 64        # query_dim, context_dim, hidden_dim

    keys = jax.random.split(key, 11)
    query = jax.random.normal(keys[0], (B, Q, Dq), dtype=jnp.float32)
    context = jax.random.normal(keys[1], (B, C, Dc), dtype=jnp.float32)
    # Random validity mask; guarantee at least one valid context position per row.
    mask = jax.random.bernoulli(keys[2], 0.7, (B, C)).at[:, 0].set(True)

    # Parameters mimicking init_module_weights(module, 0.1).
    wq = 0.1 * jax.random.normal(keys[3], (H, Dq), dtype=jnp.float32)
    bq = 0.1 * jax.random.normal(keys[4], (H,), dtype=jnp.float32)
    wc = 0.1 * jax.random.normal(keys[5], (H, Dc), dtype=jnp.float32)
    bc = 0.1 * jax.random.normal(keys[6], (H,), dtype=jnp.float32)
    we = 0.1 * jax.random.normal(keys[7], (1, H), dtype=jnp.float32)
    be = 0.1 * jax.random.normal(keys[8], (1,), dtype=jnp.float32)
    wo = 0.1 * jax.random.normal(keys[9], (Dq, Dc + Dq), dtype=jnp.float32)
    bo = 0.1 * jax.random.normal(keys[10], (Dq,), dtype=jnp.float32)

    params = prepare_params(wq, bq, wc, bc, we, be, wo, bo, context_dim=Dc)

    out, attn = attention_forward(query, context, mask, params)
    out, attn = jax.block_until_ready((out, attn))

    with jax.default_matmul_precision("highest"):
        ref_out, ref_attn = reference(query, context, mask,
                                      wq, bq, wc, bc, we, be, wo, bo)
        ref_out, ref_attn = jax.block_until_ready((ref_out, ref_attn))

    assert out.shape == (B, Q, Dq) and attn.shape == (B, Q, C)
    assert jnp.allclose(attn, ref_attn, atol=2e-3, rtol=2e-3), "attn mismatch vs reference"
    assert jnp.allclose(out, ref_out, atol=2e-3, rtol=2e-3), "output mismatch vs reference"
    print("KERNEL_OK")
</pallas_src>

<mosaic_0001>
module attributes {stable_mosaic.version = 11 : i64} {
  func.func @attention_kernel(%arg0: i32, %arg1: memref<1x8x32xf32, #tpu.memory_space<vmem>>, %arg2: memref<1x16x48xf32, #tpu.memory_space<vmem>>, %arg3: memref<1x1x16xi32, #tpu.memory_space<vmem>>, %arg4: memref<32x64xf32, #tpu.memory_space<vmem>>, %arg5: memref<1x64xf32, #tpu.memory_space<vmem>>, %arg6: memref<48x64xf32, #tpu.memory_space<vmem>>, %arg7: memref<1x64xf32, #tpu.memory_space<vmem>>, %arg8: memref<1x64xf32, #tpu.memory_space<vmem>>, %arg9: memref<48x32xf32, #tpu.memory_space<vmem>>, %arg10: memref<32x32xf32, #tpu.memory_space<vmem>>, %arg11: memref<1x32xf32, #tpu.memory_space<vmem>>, %arg12: memref<1x8x32xf32, #tpu.memory_space<vmem>>, %arg13: memref<1x8x16xf32, #tpu.memory_space<vmem>>) attributes {dimension_semantics = [#tpu.dimension_semantics<parallel>], iteration_bounds = array<i64: 2>, scalar_prefetch = 0 : i64, scratch_operands = 0 : i64, tpu.core_type = #tpu.core_type<tc>, window_params = [{transform_indices = @transform_0, window_bounds = array<i64: 1, 8, 32>}, {transform_indices = @transform_1, window_bounds = array<i64: 1, 16, 48>}, {transform_indices = @transform_2, window_bounds = array<i64: 1, 1, 16>}, {pipeline_mode = #tpu.pipeline_mode<synchronous>, transform_indices = @transform_3, window_bounds = array<i64: 32, 64>}, {pipeline_mode = #tpu.pipeline_mode<synchronous>, transform_indices = @transform_4, window_bounds = array<i64: 1, 64>}, {pipeline_mode = #tpu.pipeline_mode<synchronous>, transform_indices = @transform_5, window_bounds = array<i64: 48, 64>}, {pipeline_mode = #tpu.pipeline_mode<synchronous>, transform_indices = @transform_6, window_bounds = array<i64: 1, 64>}, {pipeline_mode = #tpu.pipeline_mode<synchronous>, transform_indices = @transform_7, window_bounds = array<i64: 1, 64>}, {pipeline_mode = #tpu.pipeline_mode<synchronous>, transform_indices = @transform_8, window_bounds = array<i64: 48, 32>}, {pipeline_mode = #tpu.pipeline_mode<synchronous>, transform_indices = @transform_9, window_bounds = array<i64: 32, 32>}, {pipeline_mode = #tpu.pipeline_mode<synchronous>, transform_indices = @transform_10, window_bounds = array<i64: 1, 32>}, {transform_indices = @transform_11, window_bounds = array<i64: 1, 8, 32>}, {transform_indices = @transform_12, window_bounds = array<i64: 1, 8, 16>}]} {
    %c0 = arith.constant 0 : index
    %c0_0 = arith.constant 0 : index
    %c0_1 = arith.constant 0 : index
    %0 = vector.load %arg1[%c0, %c0_0, %c0_1] : memref<1x8x32xf32, #tpu.memory_space<vmem>>, vector<1x8x32xf32>
    %1 = vector.shape_cast %0 : vector<1x8x32xf32> to vector<8x32xf32>
    %c0_2 = arith.constant 0 : index
    %c0_3 = arith.constant 0 : index
    %c0_4 = arith.constant 0 : index
    %2 = vector.load %arg2[%c0_2, %c0_3, %c0_4] : memref<1x16x48xf32, #tpu.memory_space<vmem>>, vector<1x16x48xf32>
    %3 = vector.shape_cast %2 : vector<1x16x48xf32> to vector<16x48xf32>
    %c0_5 = arith.constant 0 : index
    %c0_6 = arith.constant 0 : index
    %4 = vector.load %arg4[%c0_5, %c0_6] : memref<32x64xf32, #tpu.memory_space<vmem>>, vector<32x64xf32>
    %cst = arith.constant dense<0.000000e+00> : vector<8x64xf32>
    %5 = tpu.matmul %1, %4, %cst {dimension_numbers = #tpu.dot_dimension_numbers<[1], [0], [0], [1], [0, 0, 1, 1], [], []>} : vector<8x32xf32>, vector<32x64xf32>, vector<8x64xf32> -> vector<8x64xf32>
    %c0_7 = arith.constant 0 : index
    %c0_8 = arith.constant 0 : index
    %6 = vector.load %arg5[%c0_7, %c0_8] : memref<1x64xf32, #tpu.memory_space<vmem>>, vector<1x64xf32>
    %7 = vector.broadcast %6 : vector<1x64xf32> to vector<8x64xf32>
    %8 = arith.addf %5, %7 : vector<8x64xf32>
    %c0_9 = arith.constant 0 : index
    %c0_10 = arith.constant 0 : index
    %9 = vector.load %arg6[%c0_9, %c0_10] : memref<48x64xf32, #tpu.memory_space<vmem>>, vector<48x64xf32>
    %cst_11 = arith.constant dense<0.000000e+00> : vector<16x64xf32>
    %10 = tpu.matmul %3, %9, %cst_11 {dimension_numbers = #tpu.dot_dimension_numbers<[1], [0], [0], [1], [0, 0, 1, 1], [], []>} : vector<16x48xf32>, vector<48x64xf32>, vector<16x64xf32> -> vector<16x64xf32>
    %c0_12 = arith.constant 0 : index
    %c0_13 = arith.constant 0 : index
    %11 = vector.load %arg7[%c0_12, %c0_13] : memref<1x64xf32, #tpu.memory_space<vmem>>, vector<1x64xf32>
    %12 = vector.broadcast %11 : vector<1x64xf32> to vector<16x64xf32>
    %13 = arith.addf %10, %12 : vector<16x64xf32>
    %14 = vector.shape_cast %8 : vector<8x64xf32> to vector<8x1x64xf32>
    %15 = vector.shape_cast %13 : vector<16x64xf32> to vector<1x16x64xf32>
    %16 = vector.broadcast %14 : vector<8x1x64xf32> to vector<8x16x64xf32>
    %17 = vector.broadcast %15 : vector<1x16x64xf32> to vector<8x16x64xf32>
    %18 = arith.addf %16, %17 : vector<8x16x64xf32>
    %19 = math.tanh %18 : vector<8x16x64xf32>
    %c0_14 = arith.constant 0 : index
    %c0_15 = arith.constant 0 : index
    %20 = vector.load %arg8[%c0_14, %c0_15] : memref<1x64xf32, #tpu.memory_space<vmem>>, vector<1x64xf32>
    %21 = vector.shape_cast %20 : vector<1x64xf32> to vector<1x1x64xf32>
    %22 = vector.broadcast %21 : vector<1x1x64xf32> to vector<8x16x64xf32>
    %23 = arith.mulf %19, %22 : vector<8x16x64xf32>
    %cst_16 = arith.constant dense<0.000000e+00> : vector<8x16xf32>
    %24 = vector.multi_reduction <add>, %23, %cst_16 [2] : vector<8x16x64xf32> to vector<8x16xf32>
    %c0_17 = arith.constant 0 : index
    %c0_18 = arith.constant 0 : index
    %c0_19 = arith.constant 0 : index
    %25 = vector.load %arg3[%c0_17, %c0_18, %c0_19] : memref<1x1x16xi32, #tpu.memory_space<vmem>>, vector<1x1x16xi32>
    %26 = vector.shape_cast %25 : vector<1x1x16xi32> to vector<1x16xi32>
    %c0_i32 = arith.constant 0 : i32
    %27 = vector.broadcast %c0_i32 : i32 to vector<1x16xi32>
    %28 = arith.cmpi ne, %26, %27 : vector<1x16xi32>
    %cst_20 = arith.constant 0xFF800000 : f32
    %29 = vector.shape_cast %28 : vector<1x16xi1> to vector<1x16xi1>
    %30 = vector.broadcast %29 : vector<1x16xi1> to vector<8x16xi1>
    %31 = vector.broadcast %cst_20 : f32 to vector<8x16xf32>
    %32 = arith.select %30, %24, %31 : vector<8x16xi1>, vector<8x16xf32>
    %cst_21 = arith.constant dense<0xFF800000> : vector<8xf32>
    %33 = vector.multi_reduction <maximumf>, %32, %cst_21 [1] : vector<8x16xf32> to vector<8xf32>
    %34 = vector.shape_cast %33 : vector<8xf32> to vector<8x1xf32>
    %cst_22 = arith.constant 0xFF800000 : f32
    %35 = vector.broadcast %cst_22 : f32 to vector<8x1xf32>
    %36 = arith.cmpf oeq, %34, %35 : vector<8x1xf32>
    %cst_23 = arith.constant 0.000000e+00 : f32
    %37 = vector.broadcast %cst_23 : f32 to vector<8x1xf32>
    %38 = arith.select %36, %37, %34 : vector<8x1xi1>, vector<8x1xf32>
    %39 = vector.broadcast %38 : vector<8x1xf32> to vector<8x16xf32>
    %40 = arith.subf %32, %39 : vector<8x16xf32>
    %41 = math.exp %40 : vector<8x16xf32>
    %cst_24 = arith.constant dense<0.000000e+00> : vector<8xf32>
    %42 = vector.multi_reduction <add>, %41, %cst_24 [1] : vector<8x16xf32> to vector<8xf32>
    %43 = vector.shape_cast %42 : vector<8xf32> to vector<8x1xf32>
    %cst_25 = arith.constant 0.000000e+00 : f32
    %44 = vector.broadcast %cst_25 : f32 to vector<8x1xf32>
    %45 = arith.cmpf ogt, %43, %44 : vector<8x1xf32>
    %cst_26 = arith.constant 1.000000e+00 : f32
    %46 = vector.broadcast %cst_26 : f32 to vector<8x1xf32>
    %47 = arith.select %45, %43, %46 : vector<8x1xi1>, vector<8x1xf32>
    %48 = vector.broadcast %47 : vector<8x1xf32> to vector<8x16xf32>
    %49 = arith.divf %41, %48 : vector<8x16xf32>
    %cst_27 = arith.constant dense<0.000000e+00> : vector<8x48xf32>
    %50 = tpu.matmul %49, %3, %cst_27 {dimension_numbers = #tpu.dot_dimension_numbers<[1], [0], [0], [1], [0, 0, 1, 1], [], []>} : vector<8x16xf32>, vector<16x48xf32>, vector<8x48xf32> -> vector<8x48xf32>
    %c0_28 = arith.constant 0 : index
    %c0_29 = arith.constant 0 : index
    %51 = vector.load %arg9[%c0_28, %c0_29] : memref<48x32xf32, #tpu.memory_space<vmem>>, vector<48x32xf32>
    %cst_30 = arith.constant dense<0.000000e+00> : vector<8x32xf32>
    %52 = tpu.matmul %50, %51, %cst_30 {dimension_numbers = #tpu.dot_dimension_numbers<[1], [0], [0], [1], [0, 0, 1, 1], [], []>} : vector<8x48xf32>, vector<48x32xf32>, vector<8x32xf32> -> vector<8x32xf32>
    %c0_31 = arith.constant 0 : index
    %c0_32 = arith.constant 0 : index
    %53 = vector.load %arg10[%c0_31, %c0_32] : memref<32x32xf32, #tpu.memory_space<vmem>>, vector<32x32xf32>
    %cst_33 = arith.constant dense<0.000000e+00> : vector<8x32xf32>
    %54 = tpu.matmul %1, %53, %cst_33 {dimension_numbers = #tpu.dot_dimension_numbers<[1], [0], [0], [1], [0, 0, 1, 1], [], []>} : vector<8x32xf32>, vector<32x32xf32>, vector<8x32xf32> -> vector<8x32xf32>
    %55 = arith.addf %52, %54 : vector<8x32xf32>
    %c0_34 = arith.constant 0 : index
    %c0_35 = arith.constant 0 : index
    %56 = vector.load %arg11[%c0_34, %c0_35] : memref<1x32xf32, #tpu.memory_space<vmem>>, vector<1x32xf32>
    %57 = vector.broadcast %56 : vector<1x32xf32> to vector<8x32xf32>
    %58 = arith.addf %55, %57 : vector<8x32xf32>
    %59 = math.tanh %58 : vector<8x32xf32>
    %c0_36 = arith.constant 0 : index
    %c0_37 = arith.constant 0 : index
    %c0_38 = arith.constant 0 : index
    %60 = vector.load %arg12[%c0_36, %c0_37, %c0_38] : memref<1x8x32xf32, #tpu.memory_space<vmem>>, vector<1x8x32xf32>
    %61 = vector.shape_cast %60 : vector<1x8x32xf32> to vector<8x32xf32>
    %62 = vector.shape_cast %59 : vector<8x32xf32> to vector<1x8x32xf32>
    tpu.vector_store %arg12[%c0_36, %c0_37, %c0_38], %62 {strides = array<i32>} : memref<1x8x32xf32, #tpu.memory_space<vmem>>, vector<1x8x32xf32>,
    %c0_39 = arith.constant 0 : index
    %c0_40 = arith.constant 0 : index
    %c0_41 = arith.constant 0 : index
    %63 = vector.load %arg13[%c0_39, %c0_40, %c0_41] : memref<1x8x16xf32, #tpu.memory_space<vmem>>, vector<1x8x16xf32>
    %64 = vector.shape_cast %63 : vector<1x8x16xf32> to vector<8x16xf32>
    %65 = vector.shape_cast %49 : vector<8x16xf32> to vector<1x8x16xf32>
    tpu.vector_store %arg13[%c0_39, %c0_40, %c0_41], %65 {strides = array<i32>} : memref<1x8x16xf32, #tpu.memory_space<vmem>>, vector<1x8x16xf32>,
    return
  }
  func.func @transform_0(%arg0: i32) -> (i32, i32, i32) {
    %c0_i32 = arith.constant 0 : i32
    %c0_i32_0 = arith.constant 0 : i32
    %c0_i32_1 = arith.constant 0 : i32
    return %arg0, %c0_i32, %c0_i32_0 : i32, i32, i32
  }
  func.func @transform_1(%arg0: i32) -> (i32, i32, i32) {
    %c0_i32 = arith.constant 0 : i32
    %c0_i32_0 = arith.constant 0 : i32
    %c0_i32_1 = arith.constant 0 : i32
    return %arg0, %c0_i32, %c0_i32_0 : i32, i32, i32
  }
  func.func @transform_2(%arg0: i32) -> (i32, i32, i32) {
    %c0_i32 = arith.constant 0 : i32
    %c0_i32_0 = arith.constant 0 : i32
    %c0_i32_1 = arith.constant 0 : i32
    return %arg0, %c0_i32, %c0_i32_0 : i32, i32, i32
  }
  func.func @transform_3(%arg0: i32) -> (i32, i32) {
    %c0_i32 = arith.constant 0 : i32
    %c0_i32_0 = arith.constant 0 : i32
    %c0_i32_1 = arith.constant 0 : i32
    return %c0_i32, %c0_i32_0 : i32, i32
  }
  func.func @transform_4(%arg0: i32) -> (i32, i32) {
    %c0_i32 = arith.constant 0 : i32
    %c0_i32_0 = arith.constant 0 : i32
    %c0_i32_1 = arith.constant 0 : i32
    return %c0_i32, %c0_i32_0 : i32, i32
  }
  func.func @transform_5(%arg0: i32) -> (i32, i32) {
    %c0_i32 = arith.constant 0 : i32
    %c0_i32_0 = arith.constant 0 : i32
    %c0_i32_1 = arith.constant 0 : i32
    return %c0_i32, %c0_i32_0 : i32, i32
  }
  func.func @transform_6(%arg0: i32) -> (i32, i32) {
    %c0_i32 = arith.constant 0 : i32
    %c0_i32_0 = arith.constant 0 : i32
    %c0_i32_1 = arith.constant 0 : i32
    return %c0_i32, %c0_i32_0 : i32, i32
  }
  func.func @transform_7(%arg0: i32) -> (i32, i32) {
    %c0_i32 = arith.constant 0 : i32
    %c0_i32_0 = arith.constant 0 : i32
    %c0_i32_1 = arith.constant 0 : i32
    return %c0_i32, %c0_i32_0 : i32, i32
  }
  func.func @transform_8(%arg0: i32) -> (i32, i32) {
    %c0_i32 = arith.constant 0 : i32
    %c0_i32_0 = arith.constant 0 : i32
    %c0_i32_1 = arith.constant 0 : i32
    return %c0_i32, %c0_i32_0 : i32, i32
  }
  func.func @transform_9(%arg0: i32) -> (i32, i32) {
    %c0_i32 = arith.constant 0 : i32
    %c0_i32_0 = arith.constant 0 : i32
    %c0_i32_1 = arith.constant 0 : i32
    return %c0_i32, %c0_i32_0 : i32, i32
  }
  func.func @transform_10(%arg0: i32) -> (i32, i32) {
    %c0_i32 = arith.constant 0 : i32
    %c0_i32_0 = arith.constant 0 : i32
    %c0_i32_1 = arith.constant 0 : i32
    return %c0_i32, %c0_i32_0 : i32, i32
  }
  func.func @transform_11(%arg0: i32) -> (i32, i32, i32) {
    %c0_i32 = arith.constant 0 : i32
    %c0_i32_0 = arith.constant 0 : i32
    %c0_i32_1 = arith.constant 0 : i32
    return %arg0, %c0_i32, %c0_i32_0 : i32, i32, i32
  }
  func.func @transform_12(%arg0: i32) -> (i32, i32, i32) {
    %c0_i32 = arith.constant 0 : i32
    %c0_i32_0 = arith.constant 0 : i32
    %c0_i32_1 = arith.constant 0 : i32
    return %arg0, %c0_i32, %c0_i32_0 : i32, i32, i32
  }
}

</mosaic_0001>

<bundles_post_ra>
// kernel: tpu_custom_call.1
= control target key start
LH: loop header
LB: loop body
LE: loop exit
PB: predicated region body
PF: predicated region fallthrough
CT: control target
= control target key end

     0   :  { %s2560_s0 = inlined_call_operand.hbm [shape: f32[2,8,32], index: 0, kind: input, shape index: {}]   ;;  %s2561_s1 = inlined_call_operand.vmem [shape: f32[2,16,48], index: 1, kind: input, shape index: {}]   ;;  %s2562_s2 = inlined_call_operand.vmem [shape: s32[2,1,16], index: 2, kind: input, shape index: {}]   ;;  %s2563_s3 = inlined_call_operand.hbm [shape: f32[32,64], index: 3, kind: input, shape index: {}]   ;;  %s2564_s4 = inlined_call_operand.hbm [shape: f32[1,64], index: 4, kind: input, shape index: {}]   ;;  %s2565_s5 = inlined_call_operand.vmem [shape: f32[48,64], index: 5, kind: input, shape index: {}]   ;;  %s2566_s6 = inlined_call_operand.hbm [shape: f32[1,64], index: 6, kind: input, shape index: {}]   ;;  %s2567_s7 = inlined_call_operand.hbm [shape: f32[1,64], index: 7, kind: input, shape index: {}]   ;;  %s2568_s8 = inlined_call_operand.vmem [shape: f32[48,32], index: 8, kind: input, shape index: {}]   ;;  %s2569_s9 = inlined_call_operand.vmem [shape: f32[32,32], index: 9, kind: input, shape index: {}]   ;;  %s2570_s10 = inlined_call_operand.vmem [shape: f32[1,32], index: 10, kind: input, shape index: {}]   ;;  %s2571_s11 = inlined_call_operand.hbm [shape: f32[2,8,32], index: 11, kind: output, shape index: {0}]   ;;  %s2572_s12 = inlined_call_operand.hbm [shape: f32[2,8,16], index: 12, kind: output, shape index: {1}]  }
   0x1   :  { %2580 = sst [smem:[#allocation19_spill]] %s2560_s0 }
   0x2   :  { %2581 = sst [smem:[#allocation20_spill]] %s2561_s1 }
   0x3   :  { %2582 = sst [smem:[#allocation21_spill]] %s2562_s2 }
   0x4   :  { %2583 = sst [smem:[#allocation22_spill]] %s2563_s3 }
   0x5   :  { %2584 = sst [smem:[#allocation23_spill]] %s2569_s9 }
   0x6   :  { %2585 = sst [smem:[#allocation24_spill]] %s2570_s10 }
   0x7   :  { %2586 = sst [smem:[#allocation25_spill]] %s2571_s11 }
   0x8   :  { %2587 = sst [smem:[#allocation26_spill]] %s2572_s12 }
   0x9   :  { %18 = vsyncpa [#allocation3], 0 }
   0xa   :  { %20 = vsyncpa [#allocation3 + $0x1], 0 }
   0xb   :  { %21 = vsyncpa [#allocation6], 0 }
   0xc   :  { %22 = vsyncpa [#allocation9], 0 }
   0xd   :  { %23 = vsyncpa [#allocation4], 0 }
   0xe   :  { %25 = vsyncpa [#allocation4 + $0x1], 0 }
   0xf   :  { %26 = vsyncpa [#allocation13], 0 }
  0x10   :  { %28 = vsyncpa [#allocation13 + $0x1], 0  ;;  %s2090_s21 = smov 0   ;;  %s2092_s22 = smov 0  }
  0x11   :  { %s2094_s23 = smov 0   ;;  %s2096_s24 = smov 0  }
  0x12 LB: > { %s2011_s25 = smov [#allocation5]   ;;  %s2111_s27 = sadd.s32 4294967295, %s2009_s24   ;;  %s2009_s24 = sphi %s2096_s24, %s2618_s24   ;;  %s2005_s23 = sphi %s2094_s23, %s2617_s23   ;;  %s2001_s22 = sphi %s2092_s22, %s2616_s22   ;;  %s1997_s21 = sphi %s2090_s21, %s2615_s21  }
  0x13   : > { %s349_s26 = sshll.u32 %s2011_s25, 4  ;;  %p1466_p0 = scmp.ge.s32.totalorder %s2009_s24, 1  ;;  %s2116_s26 = int_to_ptr.vmem [resolvable:$true] %s349_s26 }
  0x14   : > { %p2576_p1 = scmp.eq.s32.totalorder %s2111_s27, 0  ;;  %p337_p2 = scmp.lt.s32.totalorder %s2009_s24, 3 }
  0x15   : > { %s2012_s29 = smov [#allocation8]   ;;  %s2013_s14 = smov [#allocation7]  }
  0x16   : > { %p2118_p3 = pnand %p1466_p0, %p337_p2  ;;  %s377_s30 = sshll.u32 %s2012_s29, 4  ;;  %s2131_s30 = int_to_ptr.vmem [resolvable:$true] %s377_s30 }
  0x17   : > { %s363_s15 = sshll.u32 %s2013_s14, 4  ;;  %s2590_s3 = sld [smem:[#allocation22_spill]]  ;;  %s2133_s15 = int_to_ptr.vmem [resolvable:$true] %s363_s15 }
  0x18   : > { %s2588_s28 = scalar_select %p2118_p3, 1, 0 }
  0x19   : > { %p1646_p5 = pneg %p2118_p3 }
  0x1b   : > { %p2127_p6 = pnand %p1646_p5, %p2576_p1 }
  0x1d   : > { %s1761_s18 = scalar_lea.hbm %s2590_s3, 512  ;;  %p2143_p8 = pneg %p2127_p6 }
  0x1e   : > { %p1762_p7 = scmp.ne.s32.totalorder %s2590_s3, %s1761_s18  ;;  %p1768_p11 = scmp.lt.u32.totalorder %s1761_s18, %s2590_s3 }
  0x20   : > { %p1764_p9 = pnand %p2143_p8, %p1762_p7 }
  0x22   : > { %p1765_p10 = pneg %p1764_p9 }
  0x24   : > { %p1770_p12 = pnand %p1768_p11, %p1765_p10 }
  0x26   : > { %1773 = shalt.err (!%p1770_p12)
}
  0x27   : > { %s1774_s16 = scalar_lea.vmem %s2116_s26, 512  ;;  %p1782_p5 = scmp.lt.s32.totalorder %s2116_s26, %s2116_s26 }
  0x28   : > { %p1775_p13 = scmp.ne.s32.totalorder %s2116_s26, %s1774_s16  ;;  %p1783_p4 = scmp.lt.s32.totalorder %s1774_s16, %s1774_s16 }
  0x2a   : > { %p1777_p0 = pnand %p1775_p13, %p2143_p8  ;;  %p1784_p7 = por %p1783_p4, %p1782_p5 }
  0x2c   : > { %p1778_p2 = pneg %p1777_p0 }
  0x2e   : > { %p1785_p9 = pnand %p1784_p7, %p1778_p2 }
  0x30   : > { %1788 = shalt.err (!%p1785_p9)
}
  0x31   : > { %s2014_s17 = smov 128   ;;  %s2015_s18 = smov 8  }
  0x32   : > { %1649 = dma.hbm_to_vmem [thread:$0]  (!%p2127_p6), %s2590_s3, 512, %s2116_s26, [#allocation6], %s2014_s17, %s2014_s17, %s2015_s18  }
  0x33   : > { %s1789_s11 = scalar_lea.hbm %s2566_s6, 16 }
  0x34   : > { %p1790_p4 = scmp.ne.s32.totalorder %s2566_s6, %s1789_s11  ;;  %p1796_p12 = scmp.lt.u32.totalorder %s1789_s11, %s2566_s6 }
  0x36   : > { %p1792_p10 = pnand %p1790_p4, %p2143_p8 }
  0x38   : > { %p1793_p11 = pneg %p1792_p10 }
  0x3a   : > { %p1798_p13 = pnand %p1796_p12, %p1793_p11 }
  0x3c   : > { %1801 = shalt.err (!%p1798_p13)
}
  0x3d   : > { %s1802_s26 = scalar_lea.vmem %s2131_s30, 16  ;;  %s1809_s10 = scalar_lea.vmem %s2131_s30, 32 }
  0x3e   : > { %p1803_p0 = scmp.ne.s32.totalorder %s2131_s30, %s1802_s26  ;;  %p1810_p7 = scmp.lt.s32.totalorder %s2131_s30, %s2131_s30 }
  0x3f   : > { %p1811_p9 = scmp.lt.s32.totalorder %s1809_s10, %s1802_s26 }
  0x40   : > { %p1805_p2 = pnand %p1803_p0, %p2143_p8 }
  0x41   : > { %p1812_p4 = por %p1811_p9, %p1810_p7 }
  0x42   : > { %p1806_p5 = pneg %p1805_p2 }
  0x44   : > { %p1813_p10 = pnand %p1812_p4, %p1806_p5 }
  0x46   : > { %1816 = shalt.err (!%p1813_p10)
}
  0x47   : > { %1655 = dma.hbm_to_vmem [thread:$0]  (!%p2127_p6), %s2566_s6, 16, %s2131_s30, [#allocation9]  }
  0x48   : > { %s1817_s18 = scalar_lea.hbm %s2564_s4, 16 }
  0x49   : > { %p1818_p11 = scmp.ne.s32.totalorder %s2564_s4, %s1817_s18  ;;  %p1824_p0 = scmp.lt.u32.totalorder %s1817_s18, %s2564_s4 }
  0x4b   : > { %p1820_p12 = pnand %p1818_p11, %p2143_p8 }
  0x4d   : > { %p1821_p13 = pneg %p1820_p12 }
  0x4f   : > { %p1826_p2 = pnand %p1824_p0, %p1821_p13 }
  0x51   : > { %1829 = shalt.err (!%p1826_p2)
}
  0x52   : > { %s1830_s30 = scalar_lea.vmem %s2133_s15, 16  ;;  %s1837_s16 = scalar_lea.vmem %s2133_s15, 32 }
  0x53   : > { %p1831_p5 = scmp.ne.s32.totalorder %s2133_s15, %s1830_s30  ;;  %p1838_p4 = scmp.lt.s32.totalorder %s2133_s15, %s2133_s15 }
  0x54   : > { %p1839_p10 = scmp.lt.s32.totalorder %s1837_s16, %s1830_s30 }
  0x55   : > { %p1833_p7 = pnand %p1831_p5, %p2143_p8 }
  0x56   : > { %p1840_p11 = por %p1839_p10, %p1838_p4 }
  0x57   : > { %p1834_p9 = pneg %p1833_p7 }
  0x59   : > { %p1841_p12 = pnand %p1840_p11, %p1834_p9 }
  0x5b   : > { %1844 = shalt.err (!%p1841_p12)
}
  0x5c   : > { %1652 = dma.hbm_to_vmem [thread:$0]  (!%p2127_p6), %s2564_s4, 16, %s2133_s15, [#allocation6]  }
  0x5d   : > { %s2016_s9 = smov [#allocation10]   ;;  %s1845_s18 = scalar_lea.hbm %s2567_s7, 16 }
  0x5e   : > { %s388_s11 = sshll.u32 %s2016_s9, 4  ;;  %p1846_p13 = scmp.ne.s32.totalorder %s2567_s7, %s1845_s18  ;;  %s389_s11 = int_to_ptr.vmem [resolvable:$true] %s388_s11 }
  0x5f   : > { %p1852_p5 = scmp.lt.u32.totalorder %s1845_s18, %s2567_s7 }
  0x60   : > { %p1848_p0 = pnand %p1846_p13, %p2143_p8 }
  0x62   : > { %p1849_p2 = pneg %p1848_p0 }
  0x64   : > { %p1854_p7 = pnand %p1852_p5, %p1849_p2 }
  0x66   : > { %1857 = shalt.err (!%p1854_p7)
}
  0x67   : > { %s1858_s15 = scalar_lea.vmem %s389_s11, 16  ;;  %s1865_s30 = scalar_lea.vmem %s389_s11, 32 }
  0x68   : > { %p1859_p9 = scmp.ne.s32.totalorder %s389_s11, %s1858_s15  ;;  %p1866_p11 = scmp.lt.s32.totalorder %s389_s11, %s389_s11 }
  0x69   : > { %p1867_p12 = scmp.lt.s32.totalorder %s1865_s30, %s1858_s15 }
  0x6a   : > { %p1861_p4 = pnand %p1859_p9, %p2143_p8 }
  0x6b   : > { %p1868_p1 = por %p1867_p12, %p1866_p11 }
  0x6c   : > { %p1862_p10 = pneg %p1861_p4 }
  0x6e   : > { %p1869_p3 = pnand %p1868_p1, %p1862_p10 }
  0x70   : > { %1872 = shalt.err (!%p1869_p3)
}
  0x71   : > { %1658 = dma.hbm_to_vmem [thread:$0]  (!%p2127_p6), %s2567_s7, 16, %s389_s11, [#allocation9]  }
  0x72   : > { %s1465_s25 = sadd.s32 4294967294, %s2009_s24   ;;  %s2232_s13 = sadd.s32 1, %s2009_s24  }
  0x73   : > { %s38_s10 = ssub.s32 %s2009_s24, %s2232_s13  ;;  %s41_s9 = sadd.s32 1, %s2005_s23 }
  0x74   : > { %p39_p1 = scmp.eq.s32.totalorder %s38_s10, 0  ;;  %p48_p3 = scmp.ne.s32.totalorder %s2005_s23, %s2001_s22 }
  0x75   : > { %p49_p8 = scmp.eq.s32.totalorder %s2009_s24, 0  ;;  %p54_p13 = scmp.ne.s32.totalorder %s2001_s22, %s1997_s21 }
  0x76   : > { %s2243_s12 = scalar_select %p39_p1, %s2005_s23, %s41_s9  }
  0x77   : > { %p2245_p0 = por %p49_p8, %p48_p3  ;;  %p2593_p2 = scmp.eq.s32.totalorder %s2111_s27, 0 }
  0x78   : > { %p298_p5 = scmp.eq.s32.totalorder %s2111_s27, 1  ;;  %p304_p7 = scmp.eq.s32.totalorder %s1465_s25, 1 }
  0x79   : > { %p2251_p6 = por %p2593_p2, %p54_p13  ;;  %p1674_p9 = scmp.lt.s32.totalorder %s2009_s24, 2 }
  0x7a   : > { %s408_s18 = sand.u32 1, %s2005_s23   ;;  %p2258_p4 = por %p298_p5, %p48_p3 }
  0x7b   : > { %p2262_p10 = por %p304_p7, %p54_p13  ;;  %s1472_s29 = sshll.u32 %s408_s18, 3 }
  0x7c   : > { %s2595_s19 = scalar_select %p2258_p4, 1, 0 }
  0x7d   : > { %s2596_s20 = scalar_select %p2262_p10, 1, 0 }
  0x7e   : > { %s1473_s14 = sshll.u32 %s2009_s24, 7  ;;  %s2597_s0 = sld [smem:[#allocation19_spill]] }
  0x7f   : > { %s412_s26 = scalar_lea.vmem [#allocation2], %s1472_s29  ;;  %p2276_p11 = pnand %p1674_p9, %p2245_p0 }
  0x80   : > { %s419_s25 = sshll.u32 %s412_s26, 4  ;;  %s409_s9 = scalar_lea.sflag [#allocation3], %s408_s18  ;;  %s2272_s25 = int_to_ptr.vmem [resolvable:$true] %s419_s25 }
  0x81   : > { %p1875_p1 = pneg %p2276_p11 }
  0x84   : > { %s2270_s16 = scalar_lea.hbm %s2597_s0, %s1473_s14  ;;  %s1878_s15 = scalar_lea.hbm %s2597_s0, 256 }
  0x85   : > { %s1873_s3 = scalar_lea.hbm %s2270_s16, 128  ;;  %p1879_p13 = scmp.lt.u32.totalorder %s2270_s16, %s2597_s0 }
  0x86   : > { %p1874_p12 = scmp.ne.s32.totalorder %s2270_s16, %s1873_s3  ;;  %p1880_p0 = scmp.lt.u32.totalorder %s1878_s15, %s1873_s3 }
  0x87   : > { %p1882_p5 = scmp.lt.u32.totalorder %s1873_s3, %s2270_s16 }
  0x88   : > { %p1876_p3 = pnand %p1875_p1, %p1874_p12  ;;  %p1881_p2 = por %p1880_p0, %p1879_p13 }
  0x8a   : > { %p1877_p8 = pneg %p1876_p3  ;;  %p1883_p7 = por %p1882_p5, %p1881_p2 }
  0x8c   : > { %p1884_p9 = pnand %p1883_p7, %p1877_p8 }
  0x8e   : > { %1887 = shalt.err (!%p1884_p9)
}
  0x8f   : > { %s1888_s18 = scalar_lea.vmem %s2272_s25, 128  ;;  %s2017_s26 = smov [#allocation2]  }
  0x90   : > { %p1889_p12 = scmp.ne.s32.totalorder %s2272_s25, %s1888_s18  ;;  %s1893_s29 = sshll.u32 %s2017_s26, 4  ;;  %s1894_s29 = int_to_ptr.vmem [resolvable:$false] %s1893_s29 }
  0x91   : > { %s1895_s14 = scalar_lea.vmem %s1894_s29, 256  ;;  %p1896_p4 = scmp.lt.s32.totalorder %s2272_s25, %s1894_s29 }
  0x92   : > { %p1891_p3 = pnand %p1889_p12, %p1875_p1  ;;  %p1897_p13 = scmp.lt.s32.totalorder %s1895_s14, %s1888_s18 }
  0x94   : > { %p1892_p10 = pneg %p1891_p3  ;;  %p1898_p0 = por %p1897_p13, %p1896_p4 }
  0x96   : > { %p1899_p2 = pnand %p1898_p0, %p1892_p10 }
  0x98   : > { %1902 = shalt.err (!%p1899_p2)
}
  0x99   : > { %1662 = dma.hbm_to_vmem [thread:$0]  (!%p2276_p11), %s2270_s16, 128, %s2272_s25, %s409_s9  }
  0x9a   : > { %p2599_p8 = scmp.ne.s32.totalorder %s2588_s28, 0 }
  0x9b   : > { %s2308_s3 = sand.u32 (!%p2599_p8), 1, %s2001_s22  }
  0x9c   : > { %442 = sbr.rel (%p2599_p8) target bundleno = 1365 (0x555), region = 64  ;;  %s2311_s15 = sshll.u32 (!%p2599_p8), %s2308_s3, 3 }
  0x9d   : > { %s445_s17 = scalar_lea.sflag (!%p2599_p8), [#allocation3], %s2308_s3 }
  0xa3   : > { %1976 = dma.done.wait (%p2251_p6), %s445_s17, 128  }
  0xa4   : > { %1978 = vsyncadd (%p2251_p6), %s445_s17, 4294967168  ;;  %p2600_p4 = scmp.eq.s32.totalorder %s2111_s27, 0 }
  0xa6   : > { %1980 = dma.done.wait (%p2600_p4), [#allocation6], 528   ;;  %p2601_p10 = pmov %p2600_p4 }
  0xa7   : > { %p2602_p11 = pmov %p2600_p4 }
  0xa8   : > { %1982 = vsyncadd (%p2601_p10), [#allocation6], 4294966768 }
  0xa9   : > { %1984 = dma.done.wait (%p2602_p11), [#allocation9], 32   ;;  %p2603_p1 = pmov %p2600_p4 }
  0xaa   : > { %v2018_v0 = vmov 0.0|0.0   ;;  %vm2019_vm0 = vmmov 0   ;;  %v2020_v1 = vmov 0.0   ;;  %p518_p6 = scmp.lt.s32.totalorder %s2111_s27, 1  ;;  %v529_v2 = vld [vmem:[#allocation5] sm:$0xff]  ;;  %v530_v3 = vld [vmem:[#allocation5 + $0x8] sm:$0xff]  ;;  %v714_v23 = vlaneseq }
  0xab   : > { %1986 = vsyncadd (%p2603_p1), [#allocation9], 4294967264  ;;  %1588 = vmatprep.subr.bf16.mxu0 %v2018_v0  ;;  %1537 = vmatprep.mubr.msk.f32.mxu0 %vm2019_vm0, %v2020_v1  ;;  %v614_v4 = vld [vmem:[%s2565_s5] sm:$0xff]  ;;  %s2604_s1 = sld [smem:[#allocation20_spill]]  ;;  %v1589_v5 = vpack.c.bf16 %v530_v3, %v529_v2  ;;  %v615_v6 = vld [vmem:[%s2565_s5 + $0x8] sm:$0xff]  ;;  %vm627_vm1 = vcmask 392192  }
  0xac   : > { %s2332_s28 = scalar_select %p518_p6, %s2111_s27, 1  ;;  %v531_v7 = vld [vmem:[#allocation5 + $0x10] sm:$0xff]  ;;  %v532_v8 = vld [vmem:[#allocation5 + $0x18] sm:$0xff]  ;;  %v1594_v9 = vpack.c.bf16 %v615_v6, %v614_v4  ;;  %v616_v10 = vld [vmem:[%s2565_s5 + $0x10] sm:$0xff]  ;;  %vm540_vm2 = vcmask 261120   ;;  %v2373_v25 = vshrl.u32 %v714_v23, 7 }
  0xad   : > { %v617_v11 = vld [vmem:[%s2565_s5 + $0x18] sm:$0xff]  ;;  %1590 = vmatpush3.bf16.msra.mxu0 %v1589_v5  ;;  %v1592_v12 = vpack.c.bf16 %v532_v8, %v531_v7  ;;  %v618_v14 = vld [vmem:[%s2565_s5 + $0x20] sm:$0xff]  ;;  %v619_v15 = vld [vmem:[%s2565_s5 + $0x28] sm:$0xff]  ;;  %s2605_s0 = scalar_lea.vmem [#allocation2], %s2311_s15  ;;  %v2021_v21 = vmov 1966171168  }
  0xae   : > { %s1500_s11 = sshll.u32 %s2332_s28, 4  ;;  %v1598_v13 = vpack.c.bf16 %v617_v11, %v616_v10  ;;  %1595 = vmatprep.subr.bf16.mxu1 %v1594_v9  ;;  %1591 = vmatprep.subr.bf16.mxu0 %v2018_v0  ;;  %v1602_v17 = vpack.c.bf16 %v619_v15, %v618_v14  ;;  %v2360_v19 = vld [vmem:[%s2605_s0] sm:$0xff]  ;;  %v712_v22 = vunpack.c.l.s4 %v2021_v21  ;;  %v1484_v26 = vld [vmem:[#allocation7] ss:$0 sm:$0xff]  ;;  %v2377_v33 = vsub.s32 0, %v2373_v25  ;;  %s2606_s2 = sld [smem:[#allocation21_spill]] }
  0xaf   : > { %1597 = vmatpush3.bf16.msra.mxu1 %v1594_v9  ;;  %v1486_v37 = vld [vmem:[#allocation8] ss:$0 sm:$0xff]  ;;  %vm854_vm3 = vcmask 523264   ;;  %vm938_vm4 = vcmask 130112   ;;  %vm1003_vm6 = vcmask 1041409   ;;  %vm1005_vm7 = vcmask 1042434  }
  0xb0   : > { %1599 = vmatprep.subr.bf16.mxu1 %v1598_v13  ;;  %v713_v24 = vunpack.c.0.s8 %v712_v22  ;;  %vm1007_vm8 = vcmask 1043459   ;;  %vm1009_vm9 = vcmask 1044484   ;;  %vm1011_vm10 = vcmask 1045509   ;;  %s2607_s26 = sld [smem:[#allocation23_spill]]  ;;  %s517_s10 = scalar_lea.vmem [#allocation12], %s2311_s15 }
  0xb1   : > { %s522_s18 = scalar_lea.vmem %s2604_s1, %s1500_s11  ;;  %1593 = vmatpush3.bf16.msra.mxu0 %v1592_v12  ;;  %v2387_v12 = vld [vmem:[#allocation10] ss:$0 sm:$0xff]  ;;  %vm1013_vm11 = vcmask 1046534   ;;  %vm1015_vm12 = vcmask 1047559   ;;  %vm1019_vm14 = vcmask 130048   ;;  %s2579_s0 = sshll.u32 %s2111_s27, 7 }
  0xb2   : > { %v527_v16 = vld [vmem:[%s522_s18] sm:$0xff]  ;;  %v528_v18 = vld [vmem:[%s522_s18 + $0x8] sm:$0xff]  ;;  %1606 = vmatprep.subr.bf16.mxu0 %v2018_v0  ;;  %v716_v27 = vsub.s32 %v713_v24, %v2373_v25  ;;  %s1304_s29 = sshll.u32 %s517_s10, 4  ;;  %s1278_s14 = scalar_lea.sflag [#allocation13], %s2308_s3  ;;  %s1305_s29 = int_to_ptr.vmem [resolvable:$true] %s1304_s29 }
  0xb3   : > { %1552 = vmatprep.mubr.msk.f32.mxu1 %vm627_vm1, %v527_v16  ;;  %v1607_v20 = vpack.c.bf16 %v528_v18, %v527_v16  ;;  %1601 = vmatpush3.bf16.msra.mxu1 %v1598_v13  ;;  %s1903_s17 = scalar_lea.vmem %s1305_s29, 128  ;;  %p2609_p7 = scmp.ne.s32.totalorder %s2595_s19, 0 }
  0xb4   : > { %1538 = vmatmul.mubr.msk.f32.vlgmr.msra.gmra.mrb[0].mxu0 %vm540_vm2, %v2360_v19  ;;  %1603 = vmatprep.subr.bf16.mxu1 %v1602_v17  ;;  %s525_s18 = scalar_lea.vmem %s2606_s2, %s2332_s28  ;;  %p1904_p5 = scmp.ne.s32.totalorder %s1305_s29, %s1903_s17 }
  0xb5   : > { %1608 = vmatpush3.bf16.msra.mxu0 %v1607_v20  ;;  %1559 = vmatprep.mubr.msk.f32.mxu0 %vm2019_vm0, %v2020_v1  ;;  %s2023_s11 = smov [#allocation12]  }
  0xb6   : > { %1609 = vmatprep.subr.bf16.mxu0 %v2018_v0  ;;  %p1905_p9 = pnand %p1904_p5, %p2609_p7  ;;  %s1907_s16 = sshll.u32 %s2023_s11, 4  ;;  %s1908_s16 = int_to_ptr.vmem [resolvable:$false] %s1907_s16 }
  0xb7   : > { %1605 = vmatpush3.bf16.msra.mxu1 %v1602_v17  ;;  %s1909_s25 = scalar_lea.vmem %s1908_s16, 256  ;;  %p1910_p3 = scmp.lt.s32.totalorder %s1305_s29, %s1908_s16 }
  0xb8   : > { %1615 = vmatprep.subr.bf16.mxu1 %v2018_v0  ;;  %p1906_p12 = pneg %p1905_p9  ;;  %p1911_p13 = scmp.lt.s32.totalorder %s1909_s25, %s1903_s17 }
  0xba   : > { %1553 = vmatmul.mubr.msk.f32.vlgmr.msra.gmra.mrb[0].mxu1 %vm627_vm1, %v528_v18  ;;  %p1912_p0 = por %p1911_p13, %p1910_p3 }
  0xbb   : > { %1585 = vmatprep.mubr.msk.f32.mxu1 %vm2019_vm0, %v2020_v1 }
  0xbc   : > { %p1913_p2 = pnand %p1912_p0, %p1906_p12 }
 0x187   : > { %v610_v28 = vpop.f32.mrb[0].mxu0 }
 0x188   : > { %v611_v29 = vadd.f32 %v1484_v26, %v610_v28  ;;  %v1539_v30 = vpop.f32.mrb[1].mxu0 }
 0x18a   : > { %v710_v31 = vcombine.high %v611_v29, %v611_v29  ;;  %v717_v32 = vrot.slane %v611_v29, %v716_v27 }
 0x18c   : > { %v724_v34 = vrot.slane %v710_v31, %v716_v27  ;;  %v725_v35 = vcombine.high %v717_v32, %v717_v32  ;;  %v733_v36 = vrot.slane %v717_v32, %v716_v27 }
 0x18d   : > { %v1554_v38 = vpop.f32.mrb[0].mxu1 }
 0x18e   : > { %v726_v39 = vcombine.high %v724_v34, %v724_v34  ;;  %v740_v40 = vrot.slane %v724_v34, %v716_v27  ;;  %v747_v41 = vrot.slane %v725_v35, %v716_v27  ;;  %v755_v42 = vcombine.high %v733_v36, %v733_v36  ;;  %v700_v43 = vpop.f32.mrb[1].mxu1 }
 0x18f   : > { %v762_v44 = vrot.slane %v733_v36, %v2377_v33  ;;  %v706_v45 = vadd.f32 %v1554_v38, %v1486_v37  ;;  %v701_v46 = vadd.f32 %v1486_v37, %v700_v43 }
 0x190   : > { %v754_v47 = vrot.slane %v726_v39, %v716_v27  ;;  %v756_v48 = vcombine.high %v740_v40, %v740_v40  ;;  %v757_v49 = vcombine.high %v747_v41, %v747_v41  ;;  %v766_v50 = vrot.slane %v747_v41, %v2377_v33 }
 0x191   : > { %v770_v51 = vrot.slane %v755_v42, %v2377_v33  ;;  %v778_v52 = vrot.slane %v740_v40, %v2377_v33  ;;  %v799_v53 = vadd.f32 %v762_v44, %v701_v46  ;;  %v800_v54 = vadd.f32 %v762_v44, %v706_v45 }
 0x192   : > { %v758_v55 = vcombine.high %v754_v47, %v754_v47  ;;  %v774_v56 = vrot.slane %v757_v49, %v2377_v33  ;;  %v782_v57 = vrot.slane %v754_v47, %v2377_v33  ;;  %v786_v58 = vrot.slane %v756_v48, %v2377_v33 }
 0x193   : > { %1723 = vtanh.f32 %v799_v53  ;;  %v801_v59 = vadd.f32 %v766_v50, %v701_v46  ;;  %v802_v60 = vadd.f32 %v766_v50, %v706_v45  ;;  %v803_v61 = vadd.f32 %v770_v51, %v701_v46 }
 0x194   : > { %v790_v62 = vrot.slane %v758_v55, %v2377_v33  ;;  %1725 = vtanh.f32 %v800_v54  ;;  %v804_v63 = vadd.f32 %v770_v51, %v706_v45  ;;  %v807_v2 = vadd.f32 %v778_v52, %v701_v46 }
 0x195   : > { %1727 = vtanh.f32 %v801_v59  ;;  %v808_v3 = vadd.f32 %v778_v52, %v706_v45  ;;  %v805_v4 = vadd.f32 %v774_v56, %v701_v46  ;;  %v806_v5 = vadd.f32 %v774_v56, %v706_v45 }
 0x196   : > { %1729 = vtanh.f32 %v802_v60  ;;  %v809_v6 = vadd.f32 %v782_v57, %v701_v46  ;;  %v810_v7 = vadd.f32 %v782_v57, %v706_v45  ;;  %v811_v8 = vadd.f32 %v786_v58, %v701_v46 }
 0x197   : > { %1731 = vtanh.f32 %v803_v61  ;;  %v812_v9 = vadd.f32 %v786_v58, %v706_v45  ;;  %v813_v10 = vadd.f32 %v790_v62, %v701_v46  ;;  %v814_v11 = vadd.f32 %v790_v62, %v706_v45 }
 0x198   : > { %1733 = vtanh.f32 %v804_v63 }
 0x199   : > { %1735 = vtanh.f32 %v807_v2 }
 0x19a   : > { %1737 = vtanh.f32 %v808_v3 }
 0x19b   : > { %1739 = vtanh.f32 %v805_v4 }
 0x19c   : > { %1741 = vtanh.f32 %v806_v5 }
 0x19d   : > { %v1724_v13 = vpop.eup %1723  ;;  %1743 = vtanh.f32 %v809_v6 }
 0x19e   : > { %v1726_v14 = vpop.eup %1725  ;;  %v838_v15 = vmul.f32 %v1724_v13, %v2387_v12  ;;  %1745 = vtanh.f32 %v810_v7 }
 0x19f   : > { %v1728_v16 = vpop.eup %1727  ;;  %v839_v21 = vmul.f32 %v1726_v14, %v2387_v12  ;;  %1747 = vtanh.f32 %v811_v8 }
 0x1a0   : > { %v1730_v17 = vpop.eup %1729  ;;  %v855_v18 = vsel %vm854_vm3, %v838_v15, 0.0  ;;  %v840_v20 = vmul.f32 %v1728_v16, %v2387_v12  ;;  %1749 = vtanh.f32 %v812_v9  ;;  %v928_v9 = vand.u32 127, %v714_v23 }
 0x1a1   : > { %v1732_v22 = vpop.eup %1731  ;;  %856 = vadd.xlane.f32.xlu0 %v855_v18  ;;  %v841_v26 = vmul.f32 %v1730_v17, %v2387_v12  ;;  %v858_v28 = vsel %vm854_vm3, %v839_v21, 0.0  ;;  %1751 = vtanh.f32 %v813_v10  ;;  %v903_v18 = vld [vmem:[%s525_s18] sm:$0x1]  ;;  %s2608_s18 = sld [smem:[#allocation26_spill]] }
 0x1a2   : > { %v861_v24 = vsel %vm854_vm3, %v840_v20, 0.0  ;;  %v1734_v27 = vpop.eup %1733  ;;  %v842_v29 = vmul.f32 %v1732_v22, %v2387_v12  ;;  %1753 = vtanh.f32 %v814_v11  ;;  %v933_v11 = vadd.s32 4294967288, %v928_v9 }
 0x1a3   : > { %862 = vadd.xlane.f32.xlu1 %v861_v24  ;;  %v1736_v30 = vpop.eup %1735  ;;  %v864_v31 = vsel %vm854_vm3, %v841_v26, 0.0  ;;  %v843_v32 = vmul.f32 %v1734_v27, %v2387_v12  ;;  %v931_v16 = vsub.s32 %v928_v9, %v2373_v25  ;;  %vm904_vm5 = vcmp.ne.s32.totalorder %v903_v18, 0  ;;  %v1111_v9 = vld [vmem:[%s2568_s8 + $0x18] sm:$0xff] }
 0x1a4   : > { %v1738_v34 = vpop.eup %1737  ;;  %v867_v35 = vsel %vm854_vm3, %v842_v29, 0.0  ;;  %v846_v36 = vmul.f32 %v1736_v30, %v2387_v12  ;;  %v936_v14 = vsub.s32 %v933_v11, %v2373_v25  ;;  %v1112_v11 = vld [vmem:[%s2568_s8 + $0x20] sm:$0xff] }
 0x1a5   : > { %859 = vadd.xlane.f32.xlu0 %v858_v28  ;;  %v1740_v37 = vpop.eup %1739  ;;  %v870_v38 = vsel %vm854_vm3, %v843_v32, 0.0  ;;  %v847_v39 = vmul.f32 %v1738_v34, %v2387_v12 }
 0x1a6   : > { %v1742_v40 = vpop.eup %1741  ;;  %v879_v41 = vsel %vm854_vm3, %v846_v36, 0.0  ;;  %v844_v42 = vmul.f32 %v1740_v37, %v2387_v12  ;;  %v2022_v36 = vmov 0  }
 0x1a7   : > { %865 = vadd.xlane.f32.xlu1 %v864_v31  ;;  %v1744_v43 = vpop.eup %1743  ;;  %v882_v44 = vsel %vm854_vm3, %v847_v39, 0.0  ;;  %v845_v45 = vmul.f32 %v1742_v40, %v2387_v12  ;;  %v905_v37 = vsel %vm904_vm5, 1, %v2022_v36  ;;  %s2486_s28 = scalar_lea.hbm %s2608_s18, %s2579_s0 }
 0x1a8   : > { %v1746_v46 = vpop.eup %1745  ;;  %v873_v47 = vsel %vm854_vm3, %v844_v42, 0.0  ;;  %v848_v48 = vmul.f32 %v1744_v43, %v2387_v12 }
 0x1a9   : > { %868 = vadd.xlane.f32.xlu0 %v867_v35  ;;  %v1748_v49 = vpop.eup %1747  ;;  %v876_v50 = vsel %vm854_vm3, %v845_v45, 0.0  ;;  %v849_v51 = vmul.f32 %v1746_v46, %v2387_v12 }
 0x1aa   : > { %v1750_v52 = vpop.eup %1749  ;;  %v885_v53 = vsel %vm854_vm3, %v848_v48, 0.0  ;;  %v850_v54 = vmul.f32 %v1748_v49, %v2387_v12  ;;  %v909_v48 = vrot.slane %v905_v37, %v2377_v33 }
 0x1ab   : > { %871 = vadd.xlane.f32.xlu1 %v870_v38  ;;  %v1752_v55 = vpop.eup %1751  ;;  %v888_v56 = vsel %vm854_vm3, %v849_v51, 0.0  ;;  %v851_v57 = vmul.f32 %v1750_v52, %v2387_v12 }
 0x1ac   : > { %v1754_v58 = vpop.eup %1753  ;;  %v891_v59 = vsel %vm854_vm3, %v850_v54, 0.0  ;;  %v852_v60 = vmul.f32 %v1752_v55, %v2387_v12  ;;  %vm910_vm13 = vcmp.eq.s32.totalorder %v909_v48, 1 }
 0x1ad   : > { %880 = vadd.xlane.f32.xlu0 %v879_v41  ;;  %v894_v61 = vsel %vm854_vm3, %v851_v57, 0.0  ;;  %v853_v62 = vmul.f32 %v1754_v58, %v2387_v12 }
 0x1ae   : > { %v897_v63 = vsel %vm854_vm3, %v852_v60, 0.0 }
 0x1af   : > { %883 = vadd.xlane.f32.xlu1 %v882_v44  ;;  %v900_v2 = vsel %vm854_vm3, %v853_v62, 0.0 }
 0x1b1   : > { %874 = vadd.xlane.f32.xlu0 %v873_v47 }
 0x1b3   : > { %877 = vadd.xlane.f32.xlu1 %v876_v50 }
 0x1b5   : > { %886 = vadd.xlane.f32.xlu0 %v885_v53 }
 0x1b7   : > { %889 = vadd.xlane.f32.xlu1 %v888_v56 }
 0x1b9   : > { %892 = vadd.xlane.f32.xlu0 %v891_v59 }
 0x1bb   : > { %895 = vadd.xlane.f32.xlu1 %v894_v61 }
 0x1bd   : > { %898 = vadd.xlane.f32.xlu0 %v897_v63 }
 0x1bf   : > { %901 = vadd.xlane.f32.xlu1 %v900_v2 }
 0x22e   : > { %v857_v3 = vpop.xlane.xlu0 %856 }
 0x22f   : > { %v932_v28 = vrot.slane %v857_v3, %v931_v16 }
 0x230   : > { %v863_v4 = vpop.xlane.xlu1 %862 }
 0x231   : > { %v943_v22 = vrot.slane %v863_v4, %v931_v16 }
 0x232   : > { %v860_v5 = vpop.xlane.xlu0 %859 }
 0x233   : > { %v937_v24 = vrot.slane %v860_v5, %v936_v14  ;;  %v1108_v5 = vld [vmem:[%s2568_s8] sm:$0xff] }
 0x234   : > { %v866_v6 = vpop.xlane.xlu1 %865 }
 0x235   : > { %v947_v17 = vrot.slane %v866_v6, %v936_v14  ;;  %v939_v32 = vsel %vm938_vm4, %v937_v24, %v932_v28  ;;  %v1109_v6 = vld [vmem:[%s2568_s8 + $0x8] sm:$0xff]  ;;  %v1117_v24 = vld [vmem:[%s2607_s26 + $0x18] sm:$0xff] }
 0x236   : > { %v869_v7 = vpop.xlane.xlu0 %868 }
 0x237   : > { %v952_v26 = vrot.slane %v869_v7, %v931_v16  ;;  %v948_v29 = vsel %vm938_vm4, %v947_v17, %v943_v22  ;;  %v1616_v7 = vpack.c.bf16 %v1109_v6, %v1108_v5  ;;  %v1115_v17 = vld [vmem:[%s2607_s26 + $0x8] sm:$0xff]  ;;  %v1116_v22 = vld [vmem:[%s2607_s26 + $0x10] sm:$0xff] }
 0x238   : > { %v872_v8 = vpop.xlane.xlu1 %871  ;;  %v1004_v38 = vsel %vm1003_vm6, %v948_v29, %v939_v32 }
 0x239   : > { %v956_v20 = vrot.slane %v872_v8, %v936_v14  ;;  %v1110_v8 = vld [vmem:[%s2568_s8 + $0x10] sm:$0xff]  ;;  %1617 = vmatpush3.bf16.msra.mxu1 %v1616_v7 }
 0x23a   : > { %v881_v10 = vpop.xlane.xlu0 %880  ;;  %1618 = vmatprep.subr.bf16.mxu1 %v2018_v0 }
 0x23b   : > { %v957_v31 = vsel %vm938_vm4, %v956_v20, %v952_v26  ;;  %v970_v44 = vrot.slane %v881_v10, %v931_v16  ;;  %v1619_v10 = vpack.c.bf16 %v1111_v9, %v1110_v8 }
 0x23c   : > { %v884_v13 = vpop.xlane.xlu1 %883  ;;  %v1006_v41 = vsel %vm1005_vm7, %v957_v31, %v1004_v38 }
 0x23d   : > { %v974_v39 = vrot.slane %v884_v13, %v936_v14  ;;  %v1113_v13 = vld [vmem:[%s2568_s8 + $0x28] sm:$0xff]  ;;  %1620 = vmatpush3.bf16.msra.mxu1 %v1619_v10 }
 0x23e   : > { %v875_v12 = vpop.xlane.xlu0 %874  ;;  %1621 = vmatprep.subr.bf16.mxu1 %v2018_v0 }
 0x23f   : > { %v961_v30 = vrot.slane %v875_v12, %v931_v16  ;;  %v975_v50 = vsel %vm938_vm4, %v974_v39, %v970_v44  ;;  %v1622_v12 = vpack.c.bf16 %v1113_v13, %v1112_v11 }
 0x240   : > { %v878_v15 = vpop.xlane.xlu1 %877 }
 0x241   : > { %v965_v23 = vrot.slane %v878_v15, %v936_v14  ;;  %1623 = vmatpush3.bf16.msra.mxu1 %v1622_v12 }
 0x242   : > { %v887_v21 = vpop.xlane.xlu0 %886 }
 0x243   : > { %v966_v34 = vsel %vm938_vm4, %v965_v23, %v961_v30  ;;  %v979_v42 = vrot.slane %v887_v21, %v931_v16  ;;  %v1613_v23 = vpack.c.bf16 %v1117_v24, %v1116_v22 }
 0x244   : > { %v890_v27 = vpop.xlane.xlu1 %889  ;;  %v1008_v45 = vsel %vm1007_vm8, %v966_v34, %v1006_v41 }
 0x245   : > { %v983_v35 = vrot.slane %v890_v27, %v936_v14  ;;  %v1010_v55 = vsel %vm1009_vm9, %v975_v50, %v1008_v45 }
 0x246   : > { %v893_v25 = vpop.xlane.xlu0 %892 }
 0x247   : > { %v988_v46 = vrot.slane %v893_v25, %v931_v16  ;;  %v984_v49 = vsel %vm938_vm4, %v983_v35, %v979_v42 }
 0x248   : > { %v896_v40 = vpop.xlane.xlu1 %895  ;;  %v1012_v56 = vsel %vm1011_vm10, %v984_v49, %v1010_v55 }
 0x249   : > { %v992_v43 = vrot.slane %v896_v40, %v936_v14 }
 0x24a   : > { %v899_v47 = vpop.xlane.xlu0 %898 }
 0x24b   : > { %v993_v51 = vsel %vm938_vm4, %v992_v43, %v988_v46  ;;  %v997_v53 = vrot.slane %v899_v47, %v931_v16  ;;  %v1114_v16 = vld [vmem:[%s2607_s26] sm:$0xff] }
 0x24c   : > { %v902_v52 = vpop.xlane.xlu1 %901  ;;  %v1014_v58 = vsel %vm1013_vm11, %v993_v51, %v1012_v56  ;;  %v1610_v20 = vpack.c.bf16 %v1115_v17, %v1114_v16 }
 0x24d   : > { %v1001_v54 = vrot.slane %v902_v52, %v936_v14 }
 0x24f   : > { %v1002_v57 = vsel %vm938_vm4, %v1001_v54, %v997_v53 }
 0x250   : > { %v1016_v33 = vsel %vm1015_vm12, %v1002_v57, %v1014_v58 }
 0x251   : > { %v1018_v59 = vsel %vm910_vm13, %v1016_v33, -inf }
 0x252   : > { %v1020_v60 = vsel %vm1019_vm14, %v1018_v59, -inf }
 0x253   : > { %1021 = vmax.xlane.f32.xlu0 %v1020_v60 }
 0x2e0   : > { %v1022_v61 = vpop.xlane.xlu0 %1021 }
 0x2e1   : > { %vm1023_vm15 = vcmp.eq.f32.partialorder %v1022_v61, -inf }
 0x2e2   : > { %v1024_v62 = vsel %vm1023_vm15, 0.0, %v1022_v61 }
 0x2e3   : > { %v1025_v63 = vsub.f32 %v1018_v59, %v1024_v62 }
 0x2e5   : > { %v1026_v2 = vmul.f32 1.442695, %v1025_v63 }
 0x2e7   : > { %1755 = vpow2.f32 %v1026_v2 }
 0x2f1   : > { %v1756_v3 = vpop.eup %1755 }
 0x2f2   : > { %v1028_v4 = vsel %vm1019_vm14, %v1756_v3, 0.0 }
 0x2f3   : > { %1029 = vadd.xlane.f32.xlu1 %v1028_v4 }
 0x380   : > { %v1030_v14 = vpop.xlane.xlu1 %1029 }
 0x381   : > { %vm1031_vm3 = vcmp.gt.f32.partialorder %v1030_v14, 0.0 }
 0x382   : > { %v1032_v15 = vsel %vm1031_vm3, %v1030_v14, 1.0 }
 0x383   : > { %1757 = vrcp.f32 %v1032_v15 }
 0x38d   : > { %v1758_v18 = vpop.eup %1757 }
 0x38e   : > { %v1034_v21 = vmul.f32 %v1758_v18, %v1756_v3 }
 0x390   : > { %1560 = vmatmul.mubr.msk.f32.vlgmr.msra.gmra.mrb[2].mxu0 %vm1019_vm14, %v1034_v21  ;;  %1271 = vst.msk [vmem:[%s517_s10] sm:$0xff] %vm1019_vm14, %v1034_v21 }
 0x391   : > { %1611 = vmatpush3.bf16.msra.mxu0 %v1610_v20  ;;  %1570 = vmatprep.mubr.msk.f32.mxu0 %vm2019_vm0, %v2020_v1 }
 0x392   : > { %1612 = vmatprep.subr.bf16.mxu0 %v2018_v0 }
 0x395   : > { %1614 = vmatpush3.bf16.msra.mxu0 %v1613_v23 }
 0x398   : > { %1571 = vmatmul.mubr.msk.f32.vlgmr.msra.gmra.mrb[4].mxu0 %vm540_vm2, %v2360_v19 }
 0x463   : > { %v1104_v26 = vpop.f32.mrb[2].mxu0 }
 0x464   : > { %v1561_v27 = vpop.f32.mrb[3].mxu0  ;;  %1586 = vmatmul.mubr.msk.f32.vlgmr.msra.gmra.mrb[2].mxu1 %vm627_vm1, %v1104_v26 }
 0x46b   : > { %v1184_v28 = vpop.f32.mrb[4].mxu0 }
 0x46c   : > { %v1572_v29 = vpop.f32.mrb[5].mxu0 }
 0x46d   : > { %1916 = shalt.err (!%p1913_p2)
}
 0x46e   : > { %s1917_s10 = scalar_lea.hbm %s2486_s28, 128  ;;  %s1921_s11 = scalar_lea.hbm %s2608_s18, 256 }
 0x46f   : > { %p1918_p8 = scmp.ne.s32.totalorder %s2486_s28, %s1917_s10  ;;  %p1922_p11 = scmp.lt.u32.totalorder %s2486_s28, %s2608_s18 }
 0x470   : > { %p1923_p1 = scmp.lt.u32.totalorder %s1921_s11, %s1917_s10  ;;  %p1925_p5 = scmp.lt.u32.totalorder %s1917_s10, %s2486_s28 }
 0x471   : > { %p1919_p4 = pnand %p1918_p8, %p2609_p7 }
 0x472   : > { %p1924_p6 = por %p1923_p1, %p1922_p11 }
 0x473   : > { %p1920_p10 = pneg %p1919_p4 }
 0x474   : > { %p1926_p9 = por %p1925_p5, %p1924_p6 }
 0x476   : > { %p1927_p12 = pnand %p1926_p9, %p1920_p10 }
 0x478   : > { %1930 = shalt.err (!%p1927_p12)
}
 0x479   : > { %1643 = dma.vmem_to_hbm [thread:$0]  (%p2609_p7), %s1305_s29, 128, %s2486_s28, %s1278_s14  }
 0x47a   : > { %s2610_s30 = sld [smem:[#allocation24_spill]]  ;;  %s510_s0 = scalar_lea.vmem [#allocation11], %s2311_s15 }
 0x47b   : > { %s1291_s10 = sshll.u32 %s510_s0, 4  ;;  %s2611_s9 = sshll.u32 %s2111_s27, 7  ;;  %s2517_s10 = int_to_ptr.vmem [resolvable:$true] %s1291_s10 }
 0x47c   : > { %s2612_s1 = sld [smem:[#allocation25_spill]]  ;;  %s1273_s28 = scalar_lea.sflag [#allocation4], %s2308_s3 }
 0x47d   : > { %s1931_s29 = scalar_lea.vmem %s2517_s10, 128  ;;  %s2024_s27 = smov [#allocation11]  }
 0x47e   : > { %p1932_p3 = scmp.ne.s32.totalorder %s2517_s10, %s1931_s29  ;;  %s1935_s15 = sshll.u32 %s2024_s27, 4  ;;  %s1936_s15 = int_to_ptr.vmem [resolvable:$false] %s1935_s15 }
 0x47f   : > { %s1937_s14 = scalar_lea.vmem %s1936_s15, 256  ;;  %p1938_p2 = scmp.lt.s32.totalorder %s2517_s10, %s1936_s15 }
 0x480   : > { %v1493_v1 = vld [vmem:[%s2610_s30] ss:$0 sm:$0xff]  ;;  %p1933_p13 = pnand %p1932_p3, %p2609_p7  ;;  %p1939_p8 = scmp.lt.s32.totalorder %s1937_s14, %s1931_s29 }
 0x482   : > { %s2515_s2 = scalar_lea.hbm %s2612_s1, %s2611_s9  ;;  %p1934_p0 = pneg %p1933_p13 }
 0x483   : > { %p1940_p4 = por %p1939_p8, %p1938_p2 }
 0x485   : > { %p1941_p10 = pnand %p1940_p4, %p1934_p0 }
 0x537   : > { %v1257_v0 = vpop.f32.mrb[2].mxu1 }
 0x538   : > { %v1258_v19 = vadd.f32 %v1257_v0, %v1184_v28  ;;  %v1587_v30 = vpop.f32.mrb[3].mxu1 }
 0x53a   : > { %v1268_v31 = vadd.f32 %v1493_v1, %v1258_v19 }
 0x53c   : > { %1759 = vtanh.f32 %v1268_v31 }
 0x546   : > { %v1760_v25 = vpop.eup %1759 }
 0x547   : > { %1270 = vst.msk [vmem:[%s510_s0] sm:$0xff] %vm540_vm2, %v1760_v25 }
 0x548   : > { %1944 = shalt.err (!%p1941_p10)
}
 0x549   : > { %s1945_s3 = scalar_lea.hbm %s2515_s2, 128  ;;  %s1949_s30 = scalar_lea.hbm %s2612_s1, 256 }
 0x54a   : > { %p1946_p11 = scmp.ne.s32.totalorder %s2515_s2, %s1945_s3  ;;  %p1950_p5 = scmp.lt.u32.totalorder %s2515_s2, %s2612_s1 }
 0x54b   : > { %p1951_p9 = scmp.lt.u32.totalorder %s1949_s30, %s1945_s3  ;;  %p1953_p3 = scmp.lt.u32.totalorder %s1945_s3, %s2515_s2 }
 0x54c   : > { %p1947_p1 = pnand %p1946_p11, %p2609_p7 }
 0x54d   : > { %p1952_p12 = por %p1951_p9, %p1950_p5 }
 0x54e   : > { %p1948_p6 = pneg %p1947_p1 }
 0x54f   : > { %p1954_p13 = por %p1953_p3, %p1952_p12 }
 0x551   : > { %p1955_p0 = pnand %p1954_p13, %p1948_p6 }
 0x553   : > { %1958 = shalt.err (!%p1955_p0)
}
 0x554   : > { %1642 = dma.vmem_to_hbm [thread:$0]  (%p2609_p7), %s2517_s10, 128, %s2515_s2, %s1273_s28  }
 0x555 PF: > { %s1316_s11 = sand.u32 1, %s1997_s21   ;;  %p2613_p2 = scmp.ne.s32.totalorder %s2596_s20, 0 }
 0x556   : > { %p2614_p8 = scmp.ge.s32.totalorder %s2009_s24, 2  ;;  %s1317_s16 = scalar_lea.sflag [#allocation4], %s1316_s11 }
 0x558   : > { %p1664_p4 = pnand %p2614_p8, %p2613_p2 }
 0x55a   : > { %1988 = dma.done.wait (!%p1664_p4), %s1317_s16, 128  }
 0x55b   : > { %1990 = vsyncadd (!%p1664_p4), %s1317_s16, 4294967168  ;;  %s1326_s29 = scalar_lea.sflag [#allocation13], %s1316_s11 }
 0x55c   : > { %1992 = dma.done.wait (!%p1664_p4), %s1326_s29, 128  }
 0x55d   : > { %1994 = vsyncadd (!%p1664_p4), %s1326_s29, 4294967168  ;;  %p31_p7 = scmp.ge.s32.totalorder %s2232_s13, 4   ;;  %s2615_s21 = smov %s2001_s22 }
 0x55e   : > { %s2616_s22 = smov %s2005_s23  ;;  %s2617_s23 = smov %s2243_s12 }
 0x55f   : > { %s2618_s24 = smov %s2232_s13  ;;  %33 = sbr.rel (!%p31_p7) target bundleno = 18 (0x12), region = 148 }
 0x566   :  { %1331 = vsyncpa [#allocation3], 1 }
 0x567   :  { %1333 = vsyncpa [#allocation3 + $0x1], 1 }
 0x568   :  { %1334 = vsyncpa [#allocation6], 1 }
 0x569   :  { %1335 = vsyncpa [#allocation9], 1 }
 0x56a   :  { %1336 = vsyncpa [#allocation4], 1 }
 0x56b   :  { %1338 = vsyncpa [#allocation4 + $0x1], 1 }
 0x56c   :  { %1339 = vsyncpa [#allocation13], 1 }
 0x56d   :  { %1341 = vsyncpa [#allocation13 + $0x1], 1 }

</bundles_post_ra>
